<compile_context>
chip_gen: v5e
topology: v5e:2x2
jax: 0.10.0
libtpu: 0.0.40
codegen_flags: <defaults>
</compile_context>

<pallas_src>
import functools

import jax
import jax.numpy as jnp
import numpy as np
from jax.experimental import pallas as pl
from jax.experimental.pallas import tpu as pltpu


def _round_up(x, m):
    return (x + m - 1) // m * m


def _cdiv(a, b):
    return -(-a // b)


def _apply_act_kernel(y, act):
    """Activation inside the Pallas kernel (f32). SiLU routes exp and the divide
    onto the EUP slot (pl.reciprocal approx) keeping VALU slots free."""
    if act == 'silu':
        return y * pl.reciprocal(1.0 + jnp.exp(-y), approx=True)
    if act == 'relu':
        return jnp.maximum(y, 0.0)
    if act == 'relu6':
        return jnp.clip(y, 0.0, 6.0)
    if act == 'lrelu':
        return jnp.where(y >= 0.0, y, 0.1 * y)
    raise AttributeError('Unsupported activation function type: {}'.format(act))


def _apply_act_ref(y, act):
    if act == 'silu':
        return y * jax.nn.sigmoid(y)
    if act == 'relu':
        return jnp.maximum(y, 0.0)
    if act == 'relu6':
        return jnp.clip(y, 0.0, 6.0)
    if act == 'lrelu':
        return jnp.where(y >= 0.0, y, 0.1 * y)
    raise AttributeError('Unsupported activation function type: {}'.format(act))


def _gemm_bn_act_kernel(a_ref, b_ref, shift_ref, o_ref, *, act):
    """Single-shot GEMM + fused BN shift + activation (no accumulator scratch).

    a_ref     : (tm, Kfull)    bf16 row-packed im2col tile
    b_ref     : (Kfull, Nfull) bf16 (block-diagonal) weight, BN scale folded in
    shift_ref : (1, Nfull)     f32 per-output-channel shift
    o_ref     : (tm, Nfull)    output tile (lane-dense)
    """
    y = jnp.dot(a_ref[...], b_ref[...], preferred_element_type=jnp.float32)
    y = y + shift_ref[...]                      # BN shift (scale already in b_ref)
    o_ref[...] = _apply_act_kernel(y, act).astype(o_ref.dtype)


def _im2col_nhwc(x_nhwc, ksize, stride, padding):
    """(N,H,W,C) -> (N, OH, OW, K*K*C) patches (kh-major, kw, cin-minor).

    Pure layout plumbing in the wrapper; done in the MXU dtype (bf16) so the
    expanded patch array is materialized exactly once at half width.
    """
    N, H, W, C = x_nhwc.shape
    K, S, P = ksize, stride, padding
    OH = (H + 2 * P - K) // S + 1
    OW = (W + 2 * P - K) // S + 1
    xp = jnp.pad(x_nhwc, ((0, 0), (P, P), (P, P), (0, 0)))
    cols = []
    for kh in range(K):
        for kw in range(K):
            win = jax.lax.slice(
                xp,
                (0, kh, kw, 0),
                (N, kh + S * (OH - 1) + 1, kw + S * (OW - 1) + 1, C),
                (1, S, S, 1))
            cols.append(win)                    # (N, OH, OW, C)
    return jnp.concatenate(cols, axis=-1), OH, OW


def focus_replace_conv(x_nchw, w_oihw, bn_gamma, bn_beta, bn_mean, bn_var,
                       *, stride, padding, bias=None, act='silu', eps=1e-5,
                       use_bf16=True, data_format='NCHW'):
    """FocusReplaceConv forward. x: (N, Cin, H, W); w: (Cout, Cin, K, K).

    Returns NCHW by default (PyTorch parity); data_format='NHWC' skips the final
    transpose for channels-last consumers.
    """
    N, Cin, H, W = x_nchw.shape
    Cout, Cin_w, K, K2 = w_oihw.shape
    assert Cin_w == Cin and K == K2

    mxu_dtype = jnp.bfloat16 if use_bf16 else jnp.float32

    # ---- fold BN (and optional conv bias) into per-channel scale/shift ----
    scale = (bn_gamma / jnp.sqrt(bn_var + eps)).astype(jnp.float32)          # (Cout,)
    b = jnp.zeros((Cout,), jnp.float32) if bias is None else bias.astype(jnp.float32)
    shift = ((b - bn_mean) * scale + bn_beta).astype(jnp.float32)            # (Cout,)

    # GEMM weight: OIHW -> (kh, kw, cin, cout) -> (K*K*Cin, Cout); BN scale folded.
    KKC = K * K * Cin
    w_mat = jnp.transpose(w_oihw, (2, 3, 1, 0)).reshape(KKC, Cout).astype(jnp.float32)
    w_mat = w_mat * scale[None, :]

    # ---- im2col in bf16 (materialized once, half the bytes of f32) ----
    x_nhwc = jnp.transpose(x_nchw, (0, 2, 3, 1)).astype(mxu_dtype)
    patches, OH, OW = _im2col_nhwc(x_nhwc, K, stride, padding)   # (N,OH,OW,KKC)
    M = N * OH * OW
    a = patches.reshape(M, KKC)

    # ---- row packing: lane-dense output WITHOUT padding Cout ----
    # If Cout divides 128 we pack R = 128//Cout consecutive output rows per GEMM
    # row using a block-diagonal weight kron(I_R, W): the output block is then
    # (tm, R*Cout) lane-dense and the row-major reshape back to (M, Cout) is free.
    if Cout % 128 == 0:
        R = 1
    elif 128 % Cout == 0:
        R = 128 // Cout
    else:
        R = 1            # fall back: full-extent (masked-store) Cout block
    Kfull = R * KKC      # full-extent contraction block (NOT padded to 128)
    Nfull = R * Cout

    # ---- M tiling: big tiles amortize per-step overhead; >= 2 tiles for v7x ----
    MR = _round_up(M, R) // R                       # rows in the packed view
    out_itemsize = max(np.dtype(x_nchw.dtype).itemsize, 4)
    per_row_bytes = 2 * (Kfull * np.dtype(mxu_dtype).itemsize
                         + Nfull * out_itemsize)    # double-buffered A + out
    vmem_budget = 24 * 1024 * 1024                  # safe on v5e/v6e/v7x defaults
    tm = min(1024,                                  # = 4096 original rows per step
             max(8, (vmem_budget // per_row_bytes) // 8 * 8),
             _round_up(MR, 8))
    if _cdiv(MR, tm) < 2 and MR > 16:               # keep both v7x TCs busy
        tm = _round_up(_cdiv(MR, 2), 8)
    MRp = _round_up(MR, tm)
    Mp = MRp * R

    # Zero-padded rows are inert (sliced off after the kernel); free reshape to
    # the packed view since (Mp, KKC) is row-major contiguous.
    a = jnp.pad(a, ((0, Mp - M), (0, 0))).reshape(MRp, Kfull)

    if R == 1:
        b_block = w_mat                                           # (KKC, Cout)
        shift_row = shift.reshape(1, Nfull)
    else:
        b_block = jnp.kron(jnp.eye(R, dtype=jnp.float32), w_mat)  # (Kfull, Nfull)
        shift_row = jnp.tile(shift, R).reshape(1, Nfull)
    b_block = b_block.astype(mxu_dtype)

    kernel = functools.partial(_gemm_bn_act_kernel, act=act)

    out = pl.pallas_call(
        kernel,
        out_shape=jax.ShapeDtypeStruct((MRp, Nfull), x_nchw.dtype),
        grid_spec=pltpu.PrefetchScalarGridSpec(
            num_scalar_prefetch=0,
            grid=(MRp // tm,),
            in_specs=[
                pl.BlockSpec((tm, Kfull), lambda i: (i, 0)),
                pl.BlockSpec((Kfull, Nfull), lambda i: (0, 0)),   # resident weight
                pl.BlockSpec((1, Nfull), lambda i: (0, 0)),       # resident shift
            ],
            out_specs=pl.BlockSpec((tm, Nfull), lambda i: (i, 0)),
        ),
        compiler_params=pltpu.CompilerParams(
            dimension_semantics=("parallel",)),
    )(a, b_block, shift_row)

    # Free row-major un-packing: (MRp, R*Cout) -> (Mp, Cout) -> slice valid rows.
    y = out.reshape(Mp, Cout)[:M].reshape(N, OH, OW, Cout)
    if data_format == 'NHWC':
        return y
    return jnp.transpose(y, (0, 3, 1, 2))                         # NCHW


def focus_replace_conv_ref(x_nchw, w_oihw, bn_gamma, bn_beta, bn_mean, bn_var,
                           *, stride, padding, bias=None, act='silu', eps=1e-5,
                           mxu_dtype=jnp.float32):
    """Pure-JAX reference (independent conv path). With mxu_dtype=bfloat16 it
    matches the kernel's matmul precision (bf16 operands, f32 accumulation)."""
    scale = bn_gamma / jnp.sqrt(bn_var + eps)
    b = jnp.zeros_like(bn_beta) if bias is None else bias
    shift = (b - bn_mean) * scale + bn_beta
    w_folded = w_oihw * scale[:, None, None, None]
    y = jax.lax.conv_general_dilated(
        x_nchw.astype(mxu_dtype), w_folded.astype(mxu_dtype),
        window_strides=(stride, stride),
        padding=[(padding, padding), (padding, padding)],
        dimension_numbers=('NCHW', 'OIHW', 'NCHW'),
        preferred_element_type=jnp.float32)
    y = y + shift[None, :, None, None]
    return _apply_act_ref(y, act)


if __name__ == "__main__":
    # FocusReplaceConv as used to replace the YOLOX Focus stem:
    #   Conv2d(in=4, out=32, ksize=3, stride=2, padding=1, bias=False) + BN + SiLU
    N, Cin, H, W = 2, 4, 16, 16
    Cout, K, S, P = 32, 3, 2, 1

    key = jax.random.PRNGKey(0)
    kx, kw, kg, kb, km, kv = jax.random.split(key, 6)

    x = jax.random.normal(kx, (N, Cin, H, W), jnp.float32)
    w = 0.1 * jax.random.normal(kw, (Cout, Cin, K, K), jnp.float32)

    bn_gamma = 1.0 + 0.1 * jax.random.normal(kg, (Cout,), jnp.float32)
    bn_beta = 0.05 * jax.random.normal(kb, (Cout,), jnp.float32)
    bn_mean = 0.1 * jax.random.normal(km, (Cout,), jnp.float32)
    bn_var = jax.random.uniform(kv, (Cout,), jnp.float32, minval=0.5, maxval=1.5)

    y = focus_replace_conv(x, w, bn_gamma, bn_beta, bn_mean, bn_var,
                           stride=S, padding=P, act='silu')
    y = jax.block_until_ready(y)

    # Check vs. a matched-precision reference (bf16 MXU operands, f32 accum);
    # the residual difference is the EUP approximate-reciprocal in the SiLU.
    y_ref_bf16 = focus_replace_conv_ref(x, w, bn_gamma, bn_beta, bn_mean, bn_var,
                                        stride=S, padding=P, act='silu',
                                        mxu_dtype=jnp.bfloat16)
    np.testing.assert_allclose(np.asarray(y), np.asarray(y_ref_bf16),
                               rtol=5e-3, atol=5e-3)

    # Loose check vs. the full-f32 PyTorch-equivalent reference (difference is
    # purely bf16 MXU-operand rounding + approximate reciprocal).
    y_ref_f32 = focus_replace_conv_ref(x, w, bn_gamma, bn_beta, bn_mean, bn_var,
                                       stride=S, padding=P, act='silu',
                                       mxu_dtype=jnp.float32)
    np.testing.assert_allclose(np.asarray(y), np.asarray(y_ref_f32),
                               rtol=5e-2, atol=5e-2)

    print("KERNEL_OK")
</pallas_src>

<mosaic_0001>
module attributes {stable_mosaic.version = 11 : i64} {
  func.func @_gemm_bn_act_kernel(%arg0: i32, %arg1: memref<16x144xbf16, #tpu.memory_space<vmem>>, %arg2: memref<144x128xbf16, #tpu.memory_space<vmem>>, %arg3: memref<1x128xf32, #tpu.memory_space<vmem>>, %arg4: memref<16x128xf32, #tpu.memory_space<vmem>>) attributes {dimension_semantics = [#tpu.dimension_semantics<parallel>], iteration_bounds = array<i64: 2>, scalar_prefetch = 0 : i64, scratch_operands = 0 : i64, tpu.core_type = #tpu.core_type<tc>, window_params = [{transform_indices = @transform_0, window_bounds = array<i64: 16, 144>}, {pipeline_mode = #tpu.pipeline_mode<synchronous>, transform_indices = @transform_1, window_bounds = array<i64: 144, 128>}, {pipeline_mode = #tpu.pipeline_mode<synchronous>, transform_indices = @transform_2, window_bounds = array<i64: 1, 128>}, {transform_indices = @transform_3, window_bounds = array<i64: 16, 128>}]} {
    %c0 = arith.constant 0 : index
    %c0_0 = arith.constant 0 : index
    %0 = vector.load %arg1[%c0, %c0_0] : memref<16x144xbf16, #tpu.memory_space<vmem>>, vector<16x144xbf16>
    %c0_1 = arith.constant 0 : index
    %c0_2 = arith.constant 0 : index
    %1 = vector.load %arg2[%c0_1, %c0_2] : memref<144x128xbf16, #tpu.memory_space<vmem>>, vector<144x128xbf16>
    %cst = arith.constant dense<0.000000e+00> : vector<16x128xf32>
    %2 = tpu.matmul %0, %1, %cst {dimension_numbers = #tpu.dot_dimension_numbers<[1], [0], [0], [1], [0, 0, 1, 1], [], []>} : vector<16x144xbf16>, vector<144x128xbf16>, vector<16x128xf32> -> vector<16x128xf32>
    %c0_3 = arith.constant 0 : index
    %c0_4 = arith.constant 0 : index
    %3 = vector.load %arg3[%c0_3, %c0_4] : memref<1x128xf32, #tpu.memory_space<vmem>>, vector<1x128xf32>
    %4 = vector.broadcast %3 : vector<1x128xf32> to vector<16x128xf32>
    %5 = arith.addf %2, %4 : vector<16x128xf32>
    %cst_5 = arith.constant 0.000000e+00 : f32
    %6 = vector.broadcast %cst_5 : f32 to vector<16x128xf32>
    %7 = arith.subf %6, %5 : vector<16x128xf32>
    %8 = math.exp %7 : vector<16x128xf32>
    %cst_6 = arith.constant 1.000000e+00 : f32
    %9 = vector.broadcast %cst_6 : f32 to vector<16x128xf32>
    %10 = arith.addf %9, %8 : vector<16x128xf32>
    %11 = tpu.reciprocal %10 {approx = true} : vector<16x128xf32> -> vector<16x128xf32>
    %12 = arith.mulf %5, %11 : vector<16x128xf32>
    %c0_7 = arith.constant 0 : index
    %c0_8 = arith.constant 0 : index
    %13 = vector.load %arg4[%c0_7, %c0_8] : memref<16x128xf32, #tpu.memory_space<vmem>>, vector<16x128xf32>
    tpu.vector_store %arg4[%c0_7, %c0_8], %12 {strides = array<i32>} : memref<16x128xf32, #tpu.memory_space<vmem>>, vector<16x128xf32>,
    return
  }
  func.func @transform_0(%arg0: i32) -> (i32, i32) {
    %c0_i32 = arith.constant 0 : i32
    %c0_i32_0 = arith.constant 0 : i32
    return %arg0, %c0_i32 : i32, i32
  }
  func.func @transform_1(%arg0: i32) -> (i32, i32) {
    %c0_i32 = arith.constant 0 : i32
    %c0_i32_0 = arith.constant 0 : i32
    %c0_i32_1 = arith.constant 0 : i32
    return %c0_i32, %c0_i32_0 : i32, i32
  }
  func.func @transform_2(%arg0: i32) -> (i32, i32) {
    %c0_i32 = arith.constant 0 : i32
    %c0_i32_0 = arith.constant 0 : i32
    %c0_i32_1 = arith.constant 0 : i32
    return %c0_i32, %c0_i32_0 : i32, i32
  }
  func.func @transform_3(%arg0: i32) -> (i32, i32) {
    %c0_i32 = arith.constant 0 : i32
    %c0_i32_0 = arith.constant 0 : i32
    return %arg0, %c0_i32 : i32, i32
  }
}

</mosaic_0001>

<bundles_post_ra>
// kernel: tpu_custom_call.1
= control target key start
LH: loop header
LB: loop body
LE: loop exit
PB: predicated region body
PF: predicated region fallthrough
CT: control target
= control target key end

     0   :  { %8 = vsyncpa [#allocation3], 0  ;;  %s898_s0 = inlined_call_operand.hbm [shape: bf16[32,144], index: 0, kind: input, shape index: {}]   ;;  %s899_s1 = inlined_call_operand.hbm [shape: bf16[144,128], index: 1, kind: input, shape index: {}]   ;;  %s900_s2 = inlined_call_operand.vmem [shape: f32[1,128], index: 2, kind: input, shape index: {}]   ;;  %s901_s3 = inlined_call_operand.hbm [shape: f32[32,128], index: 3, kind: output, shape index: {}]  }
   0x1   :  { %10 = vsyncpa [#allocation3 + $0x1], 0 }
   0x2   :  { %11 = vsyncpa [#allocation6], 0 }
   0x3   :  { %12 = vsyncpa [#allocation4], 0 }
   0x4   :  { %14 = vsyncpa [#allocation4 + $0x1], 0  ;;  %s751_s12 = smov 0   ;;  %s753_s13 = smov 0  }
   0x5   :  { %s755_s14 = smov 0   ;;  %s757_s15 = smov 0  }
   0x6 LB: > { %s772_s16 = sadd.s32 4294967295, %s722_s15   ;;  %s444_s17 = sadd.s32 4294967294, %s722_s15   ;;  %s722_s15 = sphi %s757_s15, %s911_s15   ;;  %s718_s14 = sphi %s755_s14, %s910_s14   ;;  %s714_s13 = sphi %s753_s13, %s909_s13   ;;  %s710_s12 = sphi %s751_s12, %s908_s12  }
   0x7   : > { %p40_p0 = scmp.ne.s32.totalorder %s714_s13, %s710_s12  ;;  %p41_p1 = scmp.eq.s32.totalorder %s772_s16, 0 }
   0x8   : > { %p106_p2 = scmp.eq.s32.totalorder %s772_s16, 1  ;;  %p112_p3 = scmp.eq.s32.totalorder %s444_s17, 1 }
   0x9   : > { %p781_p4 = por %p41_p1, %p40_p0  ;;  %p445_p5 = scmp.ge.s32.totalorder %s722_s15, 1 }
   0xa   : > { %p786_p6 = por %p112_p3, %p40_p0  ;;  %p119_p7 = scmp.lt.s32.totalorder %s722_s15, 3 }
   0xb   : > { %s130_s22 = sshll.u32 %s899_s1, 4  ;;  %s724_s24 = smov [#allocation5]   ;;  %s131_s22 = int_to_ptr.hbm [resolvable:$true] %s130_s22 }
   0xc   : > { %p794_p8 = pnand %p445_p5, %p119_p7  ;;  %s132_s25 = sshll.u32 %s724_s24, 4  ;;  %s133_s25 = int_to_ptr.vmem [resolvable:$true] %s132_s25 }
   0xd   : > { %s804_s26 = sadd.s32 1, %s722_s15   ;;  %s725_s27 = smov 64  }
   0xe   : > { %p528_p9 = pneg %p794_p8  ;;  %s726_s28 = smov 4  }
   0xf   : > { %s24_s29 = ssub.s32 %s722_s15, %s804_s26  ;;  %s27_s30 = sadd.s32 1, %s718_s14 }
  0x10   : > { %p529_p10 = pnand %p528_p9, %p41_p1  ;;  %p25_p12 = scmp.eq.s32.totalorder %s24_s29, 0 }
  0x11   : > { %p34_p13 = scmp.ne.s32.totalorder %s718_s14, %s714_s13  ;;  %p35_p0 = scmp.eq.s32.totalorder %s722_s15, 0 }
  0x12   : > { %531 = dma.hbm_to_vmem [thread:$0]  (!%p529_p10), %s131_s22, 1152, %s133_s25, [#allocation6], %s725_s27, %s725_s27, %s726_s28  }
  0x13   : > { %p541_p3 = scmp.lt.s32.totalorder %s722_s15, 2  ;;  %p36_p5 = por %p35_p0, %p34_p13 }
  0x14   : > { %s814_s4 = scalar_select %p25_p12, %s718_s14, %s27_s30  }
  0x15   : > { %p818_p7 = por %p106_p2, %p34_p13  ;;  %s149_s6 = sand.u32 1, %s718_s14  }
  0x16   : > { %s507_s7 = sshll.u32 %s722_s15, 4  ;;  %s448_s8 = sshll.u32 %s149_s6, 4 }
  0x17   : > { %s159_s11 = scalar_lea.hbm %s898_s0, %s507_s7  ;;  %s153_s20 = scalar_lea.vmem [#allocation2], %s448_s8 }
  0x18   : > { %s160_s17 = sshll.u32 %s159_s11, 4  ;;  %s162_s21 = sshll.u32 %s153_s20, 4  ;;  %s161_s17 = int_to_ptr.hbm [resolvable:$true] %s160_s17  ;;  %s163_s21 = int_to_ptr.vmem [resolvable:$true] %s162_s21 }
  0x19   : > { %p829_p9 = pnand %p541_p3, %p36_p5  ;;  %s150_s24 = scalar_lea.sflag [#allocation3], %s149_s6 }
  0x1a   : > { %s622_s25 = sshra.s32 %s161_s17, 4  ;;  %s629_s30 = scalar_lea.hbm %s898_s0, 32  ;;  %s623_s25 = int_to_ptr.hbm [resolvable:$true] %s622_s25 }
  0x1b   : > { %s624_s27 = scalar_lea.hbm %s623_s25, 16  ;;  %p626_p10 = pneg %p829_p9 }
  0x1c   : > { %p625_p2 = scmp.ne.s32.totalorder %s623_s25, %s624_s27  ;;  %p630_p0 = scmp.lt.s32.totalorder %s623_s25, %s898_s0 }
  0x1d   : > { %p631_p3 = scmp.lt.s32.totalorder %s629_s30, %s624_s27 }
  0x1e   : > { %p627_p12 = pnand %p626_p10, %p625_p2 }
  0x1f   : > { %p632_p5 = por %p631_p3, %p630_p0 }
  0x20   : > { %p628_p13 = pneg %p627_p12 }
  0x22   : > { %p633_p11 = pnand %p632_p5, %p628_p13 }
  0x24   : > { %636 = shalt.err (!%p633_p11)
}
  0x25   : > { %s727_s6 = smov 128   ;;  %s728_s9 = smov 8  }
  0x26   : > { %535 = dma.hbm_to_vmem [thread:$0]  (!%p829_p9), %s161_s17, 256, %s163_s21, %s150_s24, %s727_s6, %s727_s6, %s728_s9  }
  0x27   : > { %174 = sbr.rel (%p794_p8) target bundleno = 243 (0xf3), region = 32  ;;  %s846_s10 = sand.u32 (!%p794_p8), 1, %s714_s13  }
  0x28   : > { %s453_s11 = sshll.u32 (!%p794_p8), %s846_s10, 4  ;;  %s177_s20 = scalar_lea.sflag (!%p794_p8), [#allocation3], %s846_s10 }
  0x29   : > { %s180_s25 = scalar_lea.vmem (!%p794_p8), [#allocation2], %s453_s11 }
  0x2c   : > { %697 = dma.done.wait (%p781_p4), %s177_s20, 256  }
  0x2d   : > { %699 = vsyncadd (%p781_p4), %s177_s20, 4294967040 }
  0x2e   : > { %701 = dma.done.wait (%p41_p1), [#allocation6], 1152  }
  0x2f   : > { %703 = vsyncadd (%p41_p1), [#allocation6], 4294966144  ;;  %v517_v0 = vld [vmem:[#allocation5 + $0x38] sm:$0xff]  ;;  %v516_v1 = vld [vmem:[#allocation5 + $0x30] sm:$0xff]  ;;  %vm299_vm0 = vcmask 130048   ;;  %s519_s17 = sshll.u32 %s772_s16, 4 }
  0x30   : > { %303 = vmatpush.bf16.msra.mxu0 %v517_v0  ;;  %v518_v2 = vld [vmem:[#allocation5 + $0x40] sm:$0xff]  ;;  %v460_v4 = vld [vmem:[%s180_s25 + $0x8] sm:$0xf0]  ;;  %v512_v9 = vld [vmem:[#allocation5 + $0x10] sm:$0xff]  ;;  %s357_s24 = scalar_lea.hbm %s901_s3, %s519_s17  ;;  %s208_s27 = scalar_lea.vmem [#allocation7], %s453_s11 }
  0x31   : > { %v508_v3 = vld [vmem:[%s180_s25 + $0x4] sm:$0xf]  ;;  %324 = vmatpush.bf16.msra.mxu1 %v518_v2  ;;  %v515_v6 = vld [vmem:[#allocation5 + $0x28] sm:$0xff]  ;;  %v513_v8 = vld [vmem:[#allocation5 + $0x18] sm:$0xff]  ;;  %s358_s28 = sshll.u32 %s208_s27, 4  ;;  %s360_s29 = sshll.u32 %s357_s24, 4  ;;  %s359_s28 = int_to_ptr.vmem [resolvable:$true] %s358_s28  ;;  %s361_s29 = int_to_ptr.hbm [resolvable:$true] %s360_s29 }
  0x32   : > { %v463_v5 = vor.u32 %v508_v3, %v460_v4  ;;  %v514_v7 = vld [vmem:[#allocation5 + $0x20] sm:$0xff]  ;;  %v511_v10 = vld [vmem:[#allocation5 + $0x8] sm:$0xff]  ;;  %s346_s16 = scalar_lea.sflag [#allocation4], %s846_s10  ;;  %s666_s30 = sshra.s32 %s361_s29, 4  ;;  %s667_s30 = int_to_ptr.hbm [resolvable:$true] %s666_s30 }
  0x33   : > { %v510_v11 = vld [vmem:[#allocation5] sm:$0xff]  ;;  %v509_v13 = vld [vmem:[%s180_s25 + $0x4] sm:$0xf0]  ;;  %s668_s7 = scalar_lea.hbm %s667_s30, 16  ;;  %s672_s9 = scalar_lea.hbm %s901_s3, 32 }
  0x34   : > { %304 = vmatpush.bf16.msra.mxu0 %v516_v1  ;;  %500 = vmatmul.msk.bf16.vlgmr.msra.gmra.mxu1 %vm299_vm0, %v463_v5  ;;  %v458_v12 = vld [vmem:[%s180_s25] sm:$0xf]  ;;  %p669_p1 = scmp.ne.s32.totalorder %s667_s30, %s668_s7  ;;  %p673_p11 = scmp.lt.s32.totalorder %s667_s30, %s901_s3 }
  0x35   : > { %v459_v14 = vor.u32 %v509_v13, %v458_v12  ;;  %v583_v15 = vld [vmem:[%s900_s2] ss:$0 sm:$0xff]  ;;  %p674_p9 = scmp.lt.s32.totalorder %s672_s9, %s668_s7 }
  0x36   : > { %p670_p4 = pnand %p669_p1, %p818_p7 }
  0x37   : > { %p675_p2 = por %p674_p9, %p673_p11 }
  0x38   : > { %305 = vmatpush.bf16.msra.mxu0 %v515_v6  ;;  %p671_p8 = pneg %p670_p4 }
  0x3a   : > { %p676_p10 = pnand %p675_p2, %p671_p8 }
  0x3c   : > { %306 = vmatpush.bf16.msra.mxu0 %v514_v7 }
  0x40   : > { %307 = vmatpush.bf16.msra.mxu0 %v513_v8 }
  0x44   : > { %308 = vmatpush.bf16.msra.mxu0 %v512_v9 }
  0x48   : > { %309 = vmatpush.bf16.msra.mxu0 %v511_v10 }
  0x4c   : > { %310 = vmatpush.bf16.msra.mxu0 %v510_v11 }
  0x4f   : > { %311 = vmatmul.bf16.vlgmr.msra.gmra.mxu0 %v459_v14 }
  0xb1   : > { %v326_v16 = vpop.f32.mrf.mxu1 }
  0xb9   : > { %v328_v24 = vpop.f32.mrf.mxu1 }
  0xcc   : > { %v312_v17 = vpop.f32.mrf.mxu0 }
  0xcd   : > { %v313_v18 = vadd.f32 %v583_v15, %v312_v17 }
  0xcf   : > { %v327_v19 = vadd.f32 %v326_v16, %v313_v18 }
  0xd1   : > { %v331_v20 = vsub.f32 0.0, %v327_v19 }
  0xd3   : > { %v333_v21 = vmul.f32 1.442695, %v331_v20 }
  0xd4   : > { %v314_v22 = vpop.f32.mrf.mxu0 }
  0xd5   : > { %584 = vpow2.f32 %v333_v21  ;;  %v315_v23 = vadd.f32 %v583_v15, %v314_v22 }
  0xd7   : > { %v329_v25 = vadd.f32 %v328_v24, %v315_v23 }
  0xd9   : > { %v332_v26 = vsub.f32 0.0, %v329_v25 }
  0xdb   : > { %v585_v27 = vpop.eup %584  ;;  %v335_v28 = vmul.f32 1.442695, %v332_v26 }
  0xdc   : > { %v337_v29 = vadd.f32 1.0, %v585_v27 }
  0xdd   : > { %586 = vpow2.f32 %v335_v28 }
  0xde   : > { %588 = vrcp.f32 %v337_v29 }
  0xe3   : > { %v587_v30 = vpop.eup %586 }
  0xe4   : > { %v589_v31 = vpop.eup %588  ;;  %v338_v32 = vadd.f32 1.0, %v587_v30 }
  0xe5   : > { %v341_v33 = vmul.f32 %v589_v31, %v327_v19 }
  0xe6   : > { %590 = vrcp.f32 %v338_v32 }
  0xe7   : > { %343 = vst [vmem:[%s208_s27] sm:$0xff] %v341_v33 }
  0xec   : > { %v591_v34 = vpop.eup %590 }
  0xed   : > { %v342_v35 = vmul.f32 %v591_v34, %v329_v25 }
  0xef   : > { %344 = vst [vmem:[%s208_s27 + $0x8] sm:$0xff] %v342_v35 }
  0xf0   : > { %679 = shalt.err (!%p676_p10)
}
  0xf1   : > { %s729_s10 = smov 128   ;;  %s730_s25 = smov 8  }
  0xf2   : > { %526 = dma.vmem_to_hbm [thread:$0]  (%p818_p7), %s359_s28, 256, %s361_s29, %s346_s16, %s729_s10, %s729_s10, %s730_s25  }
  0xf3 PF: > { %s375_s18 = sand.u32 1, %s710_s12   ;;  %p907_p12 = scmp.ge.s32.totalorder %s722_s15, 2 }
  0xf4   : > { %s376_s23 = scalar_lea.sflag [#allocation4], %s375_s18 }
  0xf5   : > { %p537_p13 = pnand %p907_p12, %p786_p6 }
  0xf7   : > { %p538_p0 = pneg %p537_p13 }
  0xf9   : > { %705 = dma.done.wait (%p538_p0), %s376_s23, 256  }
  0xfa   : > { %707 = vsyncadd (%p538_p0), %s376_s23, 4294967040  ;;  %p17_p3 = scmp.ge.s32.totalorder %s804_s26, 4   ;;  %s908_s12 = smov %s714_s13 }
  0xfb   : > { %s909_s13 = smov %s718_s14  ;;  %s910_s14 = smov %s814_s4 }
  0xfc   : > { %s911_s15 = smov %s804_s26  ;;  %19 = sbr.rel (!%p17_p3) target bundleno = 6 (0x6), region = 81 }
 0x101   :  { %382 = vsyncpa [#allocation3], 1 }
 0x102   :  { %384 = vsyncpa [#allocation3 + $0x1], 1 }
 0x103   :  { %385 = vsyncpa [#allocation6], 1 }
 0x104   :  { %386 = vsyncpa [#allocation4], 1 }
 0x105   :  { %388 = vsyncpa [#allocation4 + $0x1], 1 }

</bundles_post_ra>
